<compile_context>
chip_gen: v7x
topology: tpu7x:2x2x1
jax: 0.10.0
libtpu: 0.0.40
codegen_flags: <defaults>
</compile_context>

<pallas_src>
import functools

import jax
import jax.numpy as jnp
from jax.experimental import pallas as pl
from jax.experimental.pallas import tpu as pltpu


def _layernorm(v, gamma, beta, eps=1e-5):
    mu = jnp.mean(v, axis=-1, keepdims=True)
    var = jnp.mean((v - mu) ** 2, axis=-1, keepdims=True)
    return (v - mu) * jax.lax.rsqrt(var + eps) * gamma + beta


def _encoder_kernel(x_ref, w_qkv_ref, w1_ref, w2_ref, vec_ref, out_ref,
                    *, B, S, E, H, Fp):
    f32 = jnp.float32
    T = B * S
    HE = H * E

    # static offsets into the coalesced vector slab (must match pack_params)
    off_b1 = 3 * HE
    off_bo = off_b1 + Fp
    off_g1 = off_bo + E
    off_be1 = off_g1 + E
    off_b2 = off_be1 + E
    off_g2 = off_b2 + E
    off_be2 = off_g2 + E

    x = x_ref[...]                                             # (T, E)

    # ---- fused Q / K / V' projection: one lane-dense matmul ----------------
    # (scale pre-folded into Wq/bq; Wo pre-folded into Wv/bv -> V')
    qkv = (jnp.dot(x, w_qkv_ref[...], preferred_element_type=f32)
           + vec_ref[:, 0:3 * HE])                             # (T, 3*H*E)

    def head(block, h):            # static lane slice of the fused projection
        off = block * HE + h * E
        return qkv[:, off:off + E].reshape(B, S, E)            # (B, S, E)

    # ---- attention (NO softmax in this module) ------------------------------
    # Head-batched scores/apply (see header note 6); H=4 unrolls at trace time.
    y = jnp.zeros((B, S, E), f32)
    for h in range(H):
        s_h = jnp.einsum('bqe,bke->bqk', head(0, h), head(1, h),
                         preferred_element_type=f32)           # (B, S, S)
        y = y + jnp.einsum('bqk,bke->bqe', s_h, head(2, h),
                           preferred_element_type=f32)         # Wo-folded V'
    att = y.reshape(T, E) + vec_ref[:, off_bo:off_bo + E]

    # ---- residual + LayerNorm ----------------------------------------------
    n1 = _layernorm(x + att,
                    vec_ref[:, off_g1:off_g1 + E],
                    vec_ref[:, off_be1:off_be1 + E])

    # ---- FeedForwardNetwork: Linear -> ReLU -> Linear (hidden padded to Fp) -
    h1 = jnp.maximum(
        jnp.dot(n1, w1_ref[...], preferred_element_type=f32)
        + vec_ref[:, off_b1:off_b1 + Fp], 0.0)                 # (T, Fp) dense lanes
    ffn = (jnp.dot(h1, w2_ref[...], preferred_element_type=f32)
           + vec_ref[:, off_b2:off_b2 + E])

    # ---- residual + LayerNorm + outer residual ------------------------------
    n2 = _layernorm(n1 + ffn,
                    vec_ref[:, off_g2:off_g2 + E],
                    vec_ref[:, off_be2:off_be2 + E])
    out_ref[...] = (x + n2).astype(out_ref.dtype)


def pack_params(params, *, num_heads):
    """One-time weight repacking / algebraic folding.

    Hoisted out of the per-call path -- run once for frozen weights.
    """
    E, HE = params["wq"].shape
    H = num_heads
    assert HE == H * E
    F = params["w1"].shape[1]
    Fp = ((F + 127) // 128) * 128                 # FFN hidden padded to lane width
    scale = E ** (-0.5)

    def per_head_in(w):                           # (E, H*E) -> (H, E_in, E_out)
        return w.reshape(E, H, E).transpose(1, 0, 2)

    # fold output projection Wo into V (per head) and the 1/sqrt(E) scale into Q
    wo_h = params["wo"].reshape(H, E, E)
    wvo = jnp.einsum('hij,hjk->hik', per_head_in(params["wv"]), wo_h)
    wvo = wvo.transpose(1, 0, 2).reshape(E, HE)
    bvo = jnp.einsum('hj,hjk->hk', params["bv"].reshape(H, E), wo_h).reshape(1, HE)

    w_qkv = jnp.concatenate([params["wq"] * scale, params["wk"], wvo], axis=1)
    b_qkv = jnp.concatenate([params["bq"] * scale, params["bk"], bvo], axis=1)

    # zero-pad the FFN hidden dim (exact: padded lanes stay 0 through ReLU/W2)
    w1p = jnp.zeros((E, Fp), jnp.float32).at[:, :F].set(params["w1"])
    b1p = jnp.zeros((1, Fp), jnp.float32).at[:, :F].set(params["b1"])
    w2p = jnp.zeros((Fp, E), jnp.float32).at[:F, :].set(params["w2"])

    # coalesce every bias / LayerNorm vector into ONE lane-dense slab
    vec = jnp.concatenate(
        [b_qkv, b1p, params["bo"], params["g1"], params["be1"],
         params["b2"], params["g2"], params["be2"]], axis=1)   # (1, 3HE+Fp+6E)

    return {"w_qkv": w_qkv, "w1": w1p, "w2": w2p, "vec": vec}


@functools.partial(jax.jit, static_argnames=("num_heads",))
def fc_transformer_encoder(x, packed, *, num_heads):
    B, S, E = x.shape
    Fp = packed["w1"].shape[1]
    xt = x.reshape(B * S, E)                      # flatten tokens -> matmul M dim

    kernel = functools.partial(_encoder_kernel, B=B, S=S, E=E, H=num_heads, Fp=Fp)
    vmem = pl.BlockSpec(memory_space=pltpu.MemorySpace.VMEM)  # whole array in VMEM

    out = pl.pallas_call(
        kernel,
        out_shape=jax.ShapeDtypeStruct((B * S, E), x.dtype),
        in_specs=[vmem] * 5,
        out_specs=vmem,
    )(xt, packed["w_qkv"], packed["w1"], packed["w2"], packed["vec"])
    return out.reshape(B, S, E)


def reference_encoder(x, params, *, num_heads):
    """Plain-JAX replica of the PyTorch forward (eval mode)."""
    B, S, E = x.shape
    scale = E ** (-0.5)
    q = x @ params["wq"] + params["bq"]
    k = x @ params["wk"] + params["bk"]
    v = x @ params["wv"] + params["bv"]
    q = q.reshape(B, S, num_heads, E).transpose(0, 2, 1, 3) * scale
    k = k.reshape(B, S, num_heads, E).transpose(0, 2, 1, 3)
    v = v.reshape(B, S, num_heads, E).transpose(0, 2, 1, 3)
    a = jnp.einsum("bhqd,bhkd->bhqk", q, k)
    y = jnp.einsum("bhqk,bhkd->bhqd", a, v)
    y = y.transpose(0, 2, 1, 3).reshape(B, S, num_heads * E)
    y = y @ params["wo"] + params["bo"]
    r1 = x + y
    n1 = _layernorm(r1, params["g1"], params["be1"])
    ffn = jnp.maximum(n1 @ params["w1"] + params["b1"], 0.0) @ params["w2"] + params["b2"]
    n2 = _layernorm(n1 + ffn, params["g2"], params["be2"])
    return x + n2


def make_params(key, embed, num_heads, ffn_size):
    HE = num_heads * embed
    keys = jax.random.split(key, 12)
    s = 0.05

    def w(k, shape):
        return jax.random.normal(k, shape, jnp.float32) * s

    return {
        "wq": w(keys[0], (embed, HE)), "bq": w(keys[1], (1, HE)),
        "wk": w(keys[2], (embed, HE)), "bk": w(keys[3], (1, HE)),
        "wv": w(keys[4], (embed, HE)), "bv": w(keys[5], (1, HE)),
        "wo": w(keys[6], (HE, embed)), "bo": w(keys[7], (1, embed)),
        "g1": jnp.ones((1, embed), jnp.float32),
        "be1": jnp.zeros((1, embed), jnp.float32),
        "w1": w(keys[8], (embed, ffn_size)), "b1": w(keys[9], (1, ffn_size)),
        "w2": w(keys[10], (ffn_size, embed)), "b2": w(keys[11], (1, embed)),
        "g2": jnp.ones((1, embed), jnp.float32),
        "be2": jnp.zeros((1, embed), jnp.float32),
    }


if __name__ == "__main__":
    # module args: embedding_size=32, n_heads=4, encoder_ffn_size=64,
    # msa_bias=True; dropout layers are identity (eval mode).
    B, S, E, H, F = 2, 8, 32, 4, 64

    key = jax.random.PRNGKey(0)
    kx, kp = jax.random.split(key)
    x = jax.random.normal(kx, (B, S, E), jnp.float32)
    params = make_params(kp, E, H, F)

    # one-time repack / fold (hoisted out of the per-call path)
    packed = pack_params(params, num_heads=H)

    out = fc_transformer_encoder(x, packed, num_heads=H)
    out = jax.block_until_ready(out)

    ref = reference_encoder(x, params, num_heads=H)
    assert out.shape == (B, S, E)
    # tolerance slightly relaxed vs 1e-4: Wo/scale folding re-associates f32 sums
    assert jnp.allclose(out, ref, atol=2e-4, rtol=2e-4), "mismatch vs reference"

    print("KERNEL_OK")
</pallas_src>

<mosaic_0001>
module attributes {stable_mosaic.version = 11 : i64} {
  func.func @_encoder_kernel(%arg0: memref<16x32xf32, #tpu.memory_space<vmem>>, %arg1: memref<32x384xf32, #tpu.memory_space<vmem>>, %arg2: memref<32x128xf32, #tpu.memory_space<vmem>>, %arg3: memref<128x32xf32, #tpu.memory_space<vmem>>, %arg4: memref<1x704xf32, #tpu.memory_space<vmem>>, %arg5: memref<16x32xf32, #tpu.memory_space<vmem>>) attributes {dimension_semantics = [], scalar_prefetch = 0 : i64, scratch_operands = 0 : i64, tpu.core_type = #tpu.core_type<tc>} {
    %c0 = arith.constant 0 : index
    %c0_0 = arith.constant 0 : index
    %0 = vector.load %arg0[%c0, %c0_0] : memref<16x32xf32, #tpu.memory_space<vmem>>, vector<16x32xf32>
    %c0_1 = arith.constant 0 : index
    %c0_2 = arith.constant 0 : index
    %1 = vector.load %arg1[%c0_1, %c0_2] : memref<32x384xf32, #tpu.memory_space<vmem>>, vector<32x384xf32>
    %cst = arith.constant dense<0.000000e+00> : vector<16x384xf32>
    %2 = tpu.matmul %0, %1, %cst {dimension_numbers = #tpu.dot_dimension_numbers<[1], [0], [0], [1], [0, 0, 1, 1], [], []>} : vector<16x32xf32>, vector<32x384xf32>, vector<16x384xf32> -> vector<16x384xf32>
    %c0_3 = arith.constant 0 : index
    %c0_4 = arith.constant 0 : index
    %3 = vector.load %arg4[%c0_3, %c0_4] : memref<1x704xf32, #tpu.memory_space<vmem>>, vector<1x384xf32>
    %4 = vector.broadcast %3 : vector<1x384xf32> to vector<16x384xf32>
    %5 = arith.addf %2, %4 : vector<16x384xf32>
    %cst_5 = arith.constant 0.000000e+00 : f32
    %6 = vector.broadcast %cst_5 : f32 to vector<2x8x32xf32>
    %7 = vector.extract_strided_slice %5 {offsets = [0, 0], sizes = [16, 32], strides = [1, 1]} : vector<16x384xf32> to vector<16x32xf32>
    %8 = vector.shape_cast %7 : vector<16x32xf32> to vector<2x8x32xf32>
    %9 = vector.extract_strided_slice %5 {offsets = [0, 128], sizes = [16, 32], strides = [1, 1]} : vector<16x384xf32> to vector<16x32xf32>
    %10 = vector.shape_cast %9 : vector<16x32xf32> to vector<2x8x32xf32>
    "tpu.trace_start"() <{level = 10 : i32, message = "bqe,bke->bqk"}> : () -> ()
    %cst_6 = arith.constant dense<0.000000e+00> : vector<2x8x8xf32>
    %11 = tpu.matmul %8, %10, %cst_6 {dimension_numbers = #tpu.dot_dimension_numbers<[2], [2], [1], [1], [0, 0, 0, 1, 1, 1], [0], [0]>} : vector<2x8x32xf32>, vector<2x8x32xf32>, vector<2x8x8xf32> -> vector<2x8x8xf32>
    "tpu.trace_stop"() : () -> ()
    %12 = vector.extract_strided_slice %5 {offsets = [0, 256], sizes = [16, 32], strides = [1, 1]} : vector<16x384xf32> to vector<16x32xf32>
    %13 = vector.shape_cast %12 : vector<16x32xf32> to vector<2x8x32xf32>
    "tpu.trace_start"() <{level = 10 : i32, message = "bqk,bke->bqe"}> : () -> ()
    %cst_7 = arith.constant dense<0.000000e+00> : vector<2x8x32xf32>
    %14 = tpu.matmul %11, %13, %cst_7 {dimension_numbers = #tpu.dot_dimension_numbers<[2], [1], [1], [2], [0, 0, 0, 1, 1, 2], [0], [0]>} : vector<2x8x8xf32>, vector<2x8x32xf32>, vector<2x8x32xf32> -> vector<2x8x32xf32>
    "tpu.trace_stop"() : () -> ()
    %15 = arith.addf %6, %14 : vector<2x8x32xf32>
    %16 = vector.extract_strided_slice %5 {offsets = [0, 32], sizes = [16, 32], strides = [1, 1]} : vector<16x384xf32> to vector<16x32xf32>
    %17 = vector.shape_cast %16 : vector<16x32xf32> to vector<2x8x32xf32>
    %18 = vector.extract_strided_slice %5 {offsets = [0, 160], sizes = [16, 32], strides = [1, 1]} : vector<16x384xf32> to vector<16x32xf32>
    %19 = vector.shape_cast %18 : vector<16x32xf32> to vector<2x8x32xf32>
    "tpu.trace_start"() <{level = 10 : i32, message = "bqe,bke->bqk"}> : () -> ()
    %cst_8 = arith.constant dense<0.000000e+00> : vector<2x8x8xf32>
    %20 = tpu.matmul %17, %19, %cst_8 {dimension_numbers = #tpu.dot_dimension_numbers<[2], [2], [1], [1], [0, 0, 0, 1, 1, 1], [0], [0]>} : vector<2x8x32xf32>, vector<2x8x32xf32>, vector<2x8x8xf32> -> vector<2x8x8xf32>
    "tpu.trace_stop"() : () -> ()
    %21 = vector.extract_strided_slice %5 {offsets = [0, 288], sizes = [16, 32], strides = [1, 1]} : vector<16x384xf32> to vector<16x32xf32>
    %22 = vector.shape_cast %21 : vector<16x32xf32> to vector<2x8x32xf32>
    "tpu.trace_start"() <{level = 10 : i32, message = "bqk,bke->bqe"}> : () -> ()
    %cst_9 = arith.constant dense<0.000000e+00> : vector<2x8x32xf32>
    %23 = tpu.matmul %20, %22, %cst_9 {dimension_numbers = #tpu.dot_dimension_numbers<[2], [1], [1], [2], [0, 0, 0, 1, 1, 2], [0], [0]>} : vector<2x8x8xf32>, vector<2x8x32xf32>, vector<2x8x32xf32> -> vector<2x8x32xf32>
    "tpu.trace_stop"() : () -> ()
    %24 = arith.addf %15, %23 : vector<2x8x32xf32>
    %25 = vector.extract_strided_slice %5 {offsets = [0, 64], sizes = [16, 32], strides = [1, 1]} : vector<16x384xf32> to vector<16x32xf32>
    %26 = vector.shape_cast %25 : vector<16x32xf32> to vector<2x8x32xf32>
    %27 = vector.extract_strided_slice %5 {offsets = [0, 192], sizes = [16, 32], strides = [1, 1]} : vector<16x384xf32> to vector<16x32xf32>
    %28 = vector.shape_cast %27 : vector<16x32xf32> to vector<2x8x32xf32>
    "tpu.trace_start"() <{level = 10 : i32, message = "bqe,bke->bqk"}> : () -> ()
    %cst_10 = arith.constant dense<0.000000e+00> : vector<2x8x8xf32>
    %29 = tpu.matmul %26, %28, %cst_10 {dimension_numbers = #tpu.dot_dimension_numbers<[2], [2], [1], [1], [0, 0, 0, 1, 1, 1], [0], [0]>} : vector<2x8x32xf32>, vector<2x8x32xf32>, vector<2x8x8xf32> -> vector<2x8x8xf32>
    "tpu.trace_stop"() : () -> ()
    %30 = vector.extract_strided_slice %5 {offsets = [0, 320], sizes = [16, 32], strides = [1, 1]} : vector<16x384xf32> to vector<16x32xf32>
    %31 = vector.shape_cast %30 : vector<16x32xf32> to vector<2x8x32xf32>
    "tpu.trace_start"() <{level = 10 : i32, message = "bqk,bke->bqe"}> : () -> ()
    %cst_11 = arith.constant dense<0.000000e+00> : vector<2x8x32xf32>
    %32 = tpu.matmul %29, %31, %cst_11 {dimension_numbers = #tpu.dot_dimension_numbers<[2], [1], [1], [2], [0, 0, 0, 1, 1, 2], [0], [0]>} : vector<2x8x8xf32>, vector<2x8x32xf32>, vector<2x8x32xf32> -> vector<2x8x32xf32>
    "tpu.trace_stop"() : () -> ()
    %33 = arith.addf %24, %32 : vector<2x8x32xf32>
    %34 = vector.extract_strided_slice %5 {offsets = [0, 96], sizes = [16, 32], strides = [1, 1]} : vector<16x384xf32> to vector<16x32xf32>
    %35 = vector.shape_cast %34 : vector<16x32xf32> to vector<2x8x32xf32>
    %36 = vector.extract_strided_slice %5 {offsets = [0, 224], sizes = [16, 32], strides = [1, 1]} : vector<16x384xf32> to vector<16x32xf32>
    %37 = vector.shape_cast %36 : vector<16x32xf32> to vector<2x8x32xf32>
    "tpu.trace_start"() <{level = 10 : i32, message = "bqe,bke->bqk"}> : () -> ()
    %cst_12 = arith.constant dense<0.000000e+00> : vector<2x8x8xf32>
    %38 = tpu.matmul %35, %37, %cst_12 {dimension_numbers = #tpu.dot_dimension_numbers<[2], [2], [1], [1], [0, 0, 0, 1, 1, 1], [0], [0]>} : vector<2x8x32xf32>, vector<2x8x32xf32>, vector<2x8x8xf32> -> vector<2x8x8xf32>
    "tpu.trace_stop"() : () -> ()
    %39 = vector.extract_strided_slice %5 {offsets = [0, 352], sizes = [16, 32], strides = [1, 1]} : vector<16x384xf32> to vector<16x32xf32>
    %40 = vector.shape_cast %39 : vector<16x32xf32> to vector<2x8x32xf32>
    "tpu.trace_start"() <{level = 10 : i32, message = "bqk,bke->bqe"}> : () -> ()
    %cst_13 = arith.constant dense<0.000000e+00> : vector<2x8x32xf32>
    %41 = tpu.matmul %38, %40, %cst_13 {dimension_numbers = #tpu.dot_dimension_numbers<[2], [1], [1], [2], [0, 0, 0, 1, 1, 2], [0], [0]>} : vector<2x8x8xf32>, vector<2x8x32xf32>, vector<2x8x32xf32> -> vector<2x8x32xf32>
    "tpu.trace_stop"() : () -> ()
    %42 = arith.addf %33, %41 : vector<2x8x32xf32>
    %43 = vector.shape_cast %42 : vector<2x8x32xf32> to vector<16x32xf32>
    %c0_14 = arith.constant 0 : index
    %c512 = arith.constant 512 : index
    %44 = vector.load %arg4[%c0_14, %c512] : memref<1x704xf32, #tpu.memory_space<vmem>>, vector<1x32xf32>
    %45 = vector.broadcast %44 : vector<1x32xf32> to vector<16x32xf32>
    %46 = arith.addf %43, %45 : vector<16x32xf32>
    %47 = arith.addf %0, %46 : vector<16x32xf32>
    %c0_15 = arith.constant 0 : index
    %c544 = arith.constant 544 : index
    %48 = vector.load %arg4[%c0_15, %c544] : memref<1x704xf32, #tpu.memory_space<vmem>>, vector<1x32xf32>
    %c0_16 = arith.constant 0 : index
    %c576 = arith.constant 576 : index
    %49 = vector.load %arg4[%c0_16, %c576] : memref<1x704xf32, #tpu.memory_space<vmem>>, vector<1x32xf32>
    %cst_17 = arith.constant dense<0.000000e+00> : vector<16xf32>
    %50 = vector.multi_reduction <add>, %47, %cst_17 [1] : vector<16x32xf32> to vector<16xf32>
    %51 = vector.shape_cast %50 : vector<16xf32> to vector<16x1xf32>
    %cst_18 = arith.constant 3.200000e+01 : f32
    %52 = vector.broadcast %cst_18 : f32 to vector<16x1xf32>
    %53 = arith.divf %51, %52 : vector<16x1xf32>
    %54 = vector.broadcast %53 : vector<16x1xf32> to vector<16x32xf32>
    %55 = arith.subf %47, %54 : vector<16x32xf32>
    %56 = arith.mulf %55, %55 : vector<16x32xf32>
    %cst_19 = arith.constant dense<0.000000e+00> : vector<16xf32>
    %57 = vector.multi_reduction <add>, %56, %cst_19 [1] : vector<16x32xf32> to vector<16xf32>
    %58 = vector.shape_cast %57 : vector<16xf32> to vector<16x1xf32>
    %cst_20 = arith.constant 3.200000e+01 : f32
    %59 = vector.broadcast %cst_20 : f32 to vector<16x1xf32>
    %60 = arith.divf %58, %59 : vector<16x1xf32>
    %61 = vector.broadcast %53 : vector<16x1xf32> to vector<16x32xf32>
    %62 = arith.subf %47, %61 : vector<16x32xf32>
    %cst_21 = arith.constant 9.99999974E-6 : f32
    %63 = vector.broadcast %cst_21 : f32 to vector<16x1xf32>
    %64 = arith.addf %60, %63 : vector<16x1xf32>
    %65 = math.rsqrt %64 : vector<16x1xf32>
    %66 = vector.broadcast %65 : vector<16x1xf32> to vector<16x32xf32>
    %67 = arith.mulf %62, %66 : vector<16x32xf32>
    %68 = vector.broadcast %48 : vector<1x32xf32> to vector<16x32xf32>
    %69 = arith.mulf %67, %68 : vector<16x32xf32>
    %70 = vector.broadcast %49 : vector<1x32xf32> to vector<16x32xf32>
    %71 = arith.addf %69, %70 : vector<16x32xf32>
    %c0_22 = arith.constant 0 : index
    %c0_23 = arith.constant 0 : index
    %72 = vector.load %arg2[%c0_22, %c0_23] : memref<32x128xf32, #tpu.memory_space<vmem>>, vector<32x128xf32>
    %cst_24 = arith.constant dense<0.000000e+00> : vector<16x128xf32>
    %73 = tpu.matmul %71, %72, %cst_24 {dimension_numbers = #tpu.dot_dimension_numbers<[1], [0], [0], [1], [0, 0, 1, 1], [], []>} : vector<16x32xf32>, vector<32x128xf32>, vector<16x128xf32> -> vector<16x128xf32>
    %c0_25 = arith.constant 0 : index
    %c384 = arith.constant 384 : index
    %74 = vector.load %arg4[%c0_25, %c384] : memref<1x704xf32, #tpu.memory_space<vmem>>, vector<1x128xf32>
    %75 = vector.broadcast %74 : vector<1x128xf32> to vector<16x128xf32>
    %76 = arith.addf %73, %75 : vector<16x128xf32>
    %cst_26 = arith.constant 0.000000e+00 : f32
    %77 = vector.broadcast %cst_26 : f32 to vector<16x128xf32>
    %78 = arith.maximumf %76, %77 : vector<16x128xf32>
    %c0_27 = arith.constant 0 : index
    %c0_28 = arith.constant 0 : index
    %79 = vector.load %arg3[%c0_27, %c0_28] : memref<128x32xf32, #tpu.memory_space<vmem>>, vector<128x32xf32>
    %cst_29 = arith.constant dense<0.000000e+00> : vector<16x32xf32>
    %80 = tpu.matmul %78, %79, %cst_29 {dimension_numbers = #tpu.dot_dimension_numbers<[1], [0], [0], [1], [0, 0, 1, 1], [], []>} : vector<16x128xf32>, vector<128x32xf32>, vector<16x32xf32> -> vector<16x32xf32>
    %c0_30 = arith.constant 0 : index
    %c608 = arith.constant 608 : index
    %81 = vector.load %arg4[%c0_30, %c608] : memref<1x704xf32, #tpu.memory_space<vmem>>, vector<1x32xf32>
    %82 = vector.broadcast %81 : vector<1x32xf32> to vector<16x32xf32>
    %83 = arith.addf %80, %82 : vector<16x32xf32>
    %84 = arith.addf %71, %83 : vector<16x32xf32>
    %c0_31 = arith.constant 0 : index
    %c640 = arith.constant 640 : index
    %85 = vector.load %arg4[%c0_31, %c640] : memref<1x704xf32, #tpu.memory_space<vmem>>, vector<1x32xf32>
    %c0_32 = arith.constant 0 : index
    %c672 = arith.constant 672 : index
    %86 = vector.load %arg4[%c0_32, %c672] : memref<1x704xf32, #tpu.memory_space<vmem>>, vector<1x32xf32>
    %cst_33 = arith.constant dense<0.000000e+00> : vector<16xf32>
    %87 = vector.multi_reduction <add>, %84, %cst_33 [1] : vector<16x32xf32> to vector<16xf32>
    %88 = vector.shape_cast %87 : vector<16xf32> to vector<16x1xf32>
    %cst_34 = arith.constant 3.200000e+01 : f32
    %89 = vector.broadcast %cst_34 : f32 to vector<16x1xf32>
    %90 = arith.divf %88, %89 : vector<16x1xf32>
    %91 = vector.broadcast %90 : vector<16x1xf32> to vector<16x32xf32>
    %92 = arith.subf %84, %91 : vector<16x32xf32>
    %93 = arith.mulf %92, %92 : vector<16x32xf32>
    %cst_35 = arith.constant dense<0.000000e+00> : vector<16xf32>
    %94 = vector.multi_reduction <add>, %93, %cst_35 [1] : vector<16x32xf32> to vector<16xf32>
    %95 = vector.shape_cast %94 : vector<16xf32> to vector<16x1xf32>
    %cst_36 = arith.constant 3.200000e+01 : f32
    %96 = vector.broadcast %cst_36 : f32 to vector<16x1xf32>
    %97 = arith.divf %95, %96 : vector<16x1xf32>
    %98 = vector.broadcast %90 : vector<16x1xf32> to vector<16x32xf32>
    %99 = arith.subf %84, %98 : vector<16x32xf32>
    %cst_37 = arith.constant 9.99999974E-6 : f32
    %100 = vector.broadcast %cst_37 : f32 to vector<16x1xf32>
    %101 = arith.addf %97, %100 : vector<16x1xf32>
    %102 = math.rsqrt %101 : vector<16x1xf32>
    %103 = vector.broadcast %102 : vector<16x1xf32> to vector<16x32xf32>
    %104 = arith.mulf %99, %103 : vector<16x32xf32>
    %105 = vector.broadcast %85 : vector<1x32xf32> to vector<16x32xf32>
    %106 = arith.mulf %104, %105 : vector<16x32xf32>
    %107 = vector.broadcast %86 : vector<1x32xf32> to vector<16x32xf32>
    %108 = arith.addf %106, %107 : vector<16x32xf32>
    %109 = arith.addf %0, %108 : vector<16x32xf32>
    %c0_38 = arith.constant 0 : index
    %c0_39 = arith.constant 0 : index
    %110 = vector.load %arg5[%c0_38, %c0_39] : memref<16x32xf32, #tpu.memory_space<vmem>>, vector<16x32xf32>
    tpu.vector_store %arg5[%c0_38, %c0_39], %109 {strides = array<i32>} : memref<16x32xf32, #tpu.memory_space<vmem>>, vector<16x32xf32>,
    return
  }
}

</mosaic_0001>

<bundles_post_ra>
// kernel: fc_transformer_encoder.1
= control target key start
LH: loop header
LB: loop body
LE: loop exit
PB: predicated region body
PF: predicated region fallthrough
CT: control target
= control target key end

     0   :  { %v2066_v7 = vmov 0.0   ;;  %s2364_s0 = inlined_call_operand.vmem [shape: f32[16,32], index: 0, kind: input, shape index: {}]   ;;  %s2365_s1 = inlined_call_operand.vmem [shape: f32[32,384], index: 1, kind: input, shape index: {}]   ;;  %s2366_s2 = inlined_call_operand.vmem [shape: f32[32,128], index: 2, kind: input, shape index: {}]   ;;  %s2367_s3 = inlined_call_operand.vmem [shape: f32[128,32], index: 3, kind: input, shape index: {}]   ;;  %s2368_s4 = inlined_call_operand.vmem [shape: f32[1,704], index: 4, kind: input, shape index: {}]   ;;  %s2369_s5 = inlined_call_operand.hbm [shape: f32[16,32], index: 5, kind: output, shape index: {}]  }
   0x1   :  { %v24_v0 = vld [vmem:[%s2365_s1 + $0x8] sm:$0xff]  ;;  %v27_v1 = vld [vmem:[%s2365_s1 + $0x20] sm:$0xff]  ;;  %v26_v4 = vld [vmem:[%s2365_s1 + $0x18] sm:$0xff]  ;;  %123 = vmatprep.mubr.f32.mxu1 %v2066_v7  ;;  %1859 = vmatprep.subr.mxu0 %v2066_v7 }
   0x2   :  { %v23_v2 = vld [vmem:[%s2365_s1] sm:$0xff]  ;;  %v1970_v3 = vpack.c.bf16 %v27_v1, %v24_v0  ;;  %v30_v5 = vld [vmem:[%s2365_s1 + $0x38] sm:$0xff]  ;;  %v33_v6 = vld [vmem:[%s2365_s1 + $0x50] sm:$0xff] }
   0x3   :  { %v1972_v8 = vpack.c.bf16 %v26_v4, %v23_v2  ;;  %v1974_v9 = vpack.c.bf16 %v33_v6, %v30_v5  ;;  %v29_v10 = vld [vmem:[%s2365_s1 + $0x30] sm:$0xff]  ;;  %v32_v11 = vld [vmem:[%s2365_s1 + $0x48] sm:$0xff] }
   0x4   :  { %1971 = vmatprep.subr.bf16.mxu1 %v1970_v3  ;;  %v25_v12 = vld [vmem:[%s2365_s1 + $0x10] sm:$0xff]  ;;  %v28_v13 = vld [vmem:[%s2365_s1 + $0x28] sm:$0xff]  ;;  %v1976_v14 = vpack.c.bf16 %v32_v11, %v29_v10 }
   0x5   :  { %1973 = vmatpush1.bf16.msra.mxu1 %v1972_v8  ;;  %v1978_v15 = vpack.c.bf16 %v28_v13, %v25_v12 }
   0x6   :  { %1975 = vmatprep.subr.bf16.mxu1 %v1974_v9 }
   0x7   :  { %10 = vsyncpa [#allocation3], 0  ;;  %v31_v16 = vld [vmem:[%s2365_s1 + $0x40] sm:$0xff]  ;;  %v34_v17 = vld [vmem:[%s2365_s1 + $0x58] sm:$0xff]  ;;  %vm52_vm0 = vcmask 261120   ;;  %vm2067_vm1 = vmmov 0   ;;  %v37_v21 = vlaneseq }
   0x8   :  { %v2145_v18 = vld [vmem:[%s2364_s0] sm:$0xff]  ;;  %v1982_v19 = vpack.c.bf16 %v34_v17, %v31_v16  ;;  %v2153_v20 = vld [vmem:[%s2364_s0 + $0x8] sm:$0xff]  ;;  %1861 = vmatprep.mubr.msk.f32.mxu0 %vm2067_vm1, %v2066_v7  ;;  %s2068_s21 = smov 96   ;;  %s2069_s22 = smov 64   ;;  %vm523_vm2 = vcmask 64512  }
   0x9   :  { %1977 = vmatpush1.bf16.msra.mxu1 %v1976_v14  ;;  %v38_v22 = vshrl.u32 %v37_v21, 7  ;;  %v35_v24 = vld [vmem:[%s2368_s4] sm:$0x7]  ;;  %s2070_s23 = smov 32  }
   0xa   :  { %1979 = vmatprep.subr.bf16.mxu1 %v1978_v15 }
   0xb   :  { %v39_v23 = vsub.s32 0, %v38_v22  ;;  %v43_v25 = vsub.s32 1, %v38_v22  ;;  %v47_v31 = vsub.s32 2, %v38_v22 }
   0xc   :  { %1738 = vmatmul.mubr.msk.f32.vlgmr.msra.gmra.mrb[0].mxu1 %vm52_vm0, %v2145_v18 }
   0xd   :  { %1981 = vmatpush3.bf16.msra.mxu1 %v1978_v15  ;;  %129 = vmatprep.mubr.f32.mxu1 %v2066_v7  ;;  %v40_v26 = vrot.slane %v35_v24, %v39_v23  ;;  %v44_v27 = vrot.slane %v35_v24, %v43_v25  ;;  %v48_v36 = vrot.slane %v35_v24, %v47_v31 }
   0xe   :  { %1983 = vmatprep.subr.bf16.mxu1 %v1982_v19 }
  0x10   :  { %1739 = vmatmul.mubr.msk.f32.gmra.mrb[2].mxu1 %vm52_vm0, %v2153_v20 }
  0x11   :  { %1985 = vmatpush3.bf16.msra.mxu1 %v1982_v19  ;;  %1841 = vmatprep.mubr.msk.f32.mxu1 %vm52_vm0, %v2145_v18 }
  0x12   :  { %1844 = vmatprep.subr.mxu1 %v2066_v7 }
  0x14   :  { %1842 = vmatmul.mubr.msk.f32.vlgmr.msra.gmra.mrb[4].mxu1 %vm52_vm0, %v2153_v20 }
  0x15   :  { %1846 = vmatprep.mubr.msk.f32.mxu1 %vm2067_vm1, %v2066_v7 }
  0xdf   :  { %v125_v28 = vpop.f32.mrb[0].mxu1 }
  0xe0   :  { %v126_v29 = vadd.f32 %v125_v28, %v40_v26  ;;  %v127_v30 = vpop.f32.mrb[1].mxu1 }
  0xe1   :  { %v128_v32 = vadd.f32 %v127_v30, %v44_v27 }
  0xe2   :  { %363 = vrot.lane.b32.xlu1 %v126_v29, %s2068_s21 }
  0xe3   :  { %v131_v33 = vpop.f32.mrb[2].mxu1  ;;  %365 = vrot.lane.b32.xlu0 %v128_v32, %s2068_s21  ;;  %1845 = vmatpush3.xpose.msk.msra.mxu1 %vm52_vm0, %v128_v32 }
  0xe4   :  { %v132_v34 = vadd.f32 %v131_v33, %v40_v26  ;;  %v133_v35 = vpop.f32.mrb[3].mxu1  ;;  %1849 = vmatprep.subr.mxu1 %v2066_v7 }
  0xe5   :  { %v134_v37 = vadd.f32 %v133_v35, %v44_v27 }
  0xe6   :  { %441 = vrot.lane.b32.xlu1 %v132_v34, %s2068_s21  ;;  %1847 = vmatmul.mubr.msk.f32.vlgmr.msra.gmra.mrb[6].mxu1 %vm52_vm0, %v126_v29 }
  0xe7   :  { %v1843_v38 = vpop.f32.mrb[4].mxu1  ;;  %443 = vrot.lane.b32.xlu0 %v134_v37, %s2068_s21  ;;  %1850 = vmatpush3.xpose.msk.msra.mxu1 %vm52_vm0, %v134_v37 }
  0xe8   :  { %v208_v39 = vadd.f32 %v1843_v38, %v48_v36  ;;  %v202_v40 = vpop.f32.mrb[5].mxu1  ;;  %1851 = vmatprep.mubr.msk.f32.mxu1 %vm2067_vm1, %v2066_v7  ;;  %1854 = vmatprep.subr.mxu1 %v2066_v7 }
  0xe9   :  { %v203_v41 = vadd.f32 %v202_v40, %v48_v36 }
  0xea   :  { %598 = vrot.lane.b32.xlu1 %v208_v39, %s2068_s21  ;;  %1852 = vmatmul.mubr.msk.f32.vlgmr.msra.gmra.mrb[8].mxu1 %vm52_vm0, %v132_v34 }
  0xeb   :  { %520 = vrot.lane.b32.xlu0 %v203_v41, %s2068_s21  ;;  %1856 = vmatprep.mubr.msk.f32.mxu1 %vm2067_vm1, %v2066_v7 }
  0xee   :  { %900 = vrot.lane.b32.xlu1 %v134_v37, %s2069_s22 }
  0xef   :  { %822 = vrot.lane.b32.xlu0 %v128_v32, %s2069_s22 }
  0xf2   :  { %898 = vrot.lane.b32.xlu1 %v132_v34, %s2069_s22 }
  0xf3   :  { %820 = vrot.lane.b32.xlu0 %v126_v29, %s2069_s22 }
  0xf6   :  { %1052 = vrot.lane.b32.xlu1 %v208_v39, %s2069_s22 }
  0xf7   :  { %976 = vrot.lane.b32.xlu0 %v203_v41, %s2069_s22 }
  0xfa   :  { %1210 = vrot.lane.b32.xlu1 %v134_v37, %s2070_s23 }
  0xfb   :  { %1132 = vrot.lane.b32.xlu0 %v128_v32, %s2070_s23  ;;  %v1766_v32 = vld [vmem:[%s2368_s4 + $0x4] ss:$0 sm:$0xff] }
  0xfe   :  { %1208 = vrot.lane.b32.xlu1 %v132_v34, %s2070_s23 }
  0xff   :  { %1130 = vrot.lane.b32.xlu0 %v126_v29, %s2070_s23 }
 0x102   :  { %1362 = vrot.lane.b32.xlu1 %v208_v39, %s2070_s23 }
 0x103   :  { %1286 = vrot.lane.b32.xlu0 %v203_v41, %s2070_s23 }
 0x154   :  { %v364_v42 = vpop.permute.xlu1 %363 }
 0x155   :  { %v366_v43 = vpop.permute.xlu0 %365 }
 0x156   :  { %1855 = vmatpush3.xpose.msk.msra.mxu1 %vm52_vm0, %v366_v43 }
 0x157   :  { %1864 = vmatprep.subr.mxu1 %v2066_v7 }
 0x158   :  { %v442_v44 = vpop.permute.xlu1 %441 }
 0x159   :  { %v444_v45 = vpop.permute.xlu0 %443  ;;  %1857 = vmatmul.mubr.msk.f32.vlgmr.msra.gmra.mrb[10].mxu1 %vm52_vm0, %v364_v42 }
 0x15a   :  { %1860 = vmatpush3.xpose.msk.msra.mxu0 %vm52_vm0, %v444_v45  ;;  %1866 = vmatprep.mubr.msk.f32.mxu1 %vm2067_vm1, %v2066_v7 }
 0x15b   :  { %1869 = vmatprep.subr.mxu0 %v2066_v7 }
 0x15c   :  { %v599_v46 = vpop.permute.xlu1 %598 }
 0x15d   :  { %v521_v47 = vpop.permute.xlu0 %520  ;;  %1862 = vmatmul.mubr.msk.f32.vlgmr.msra.gmra.mrb[0].mxu0 %vm52_vm0, %v442_v44 }
 0x15e   :  { %1865 = vmatpush3.msra.mxu1 %v521_v47  ;;  %1870 = vmatpush3.msra.mxu0 %v599_v46 }
 0x15f   :  { %1874 = vmatprep.subr.mxu1 %v2066_v7  ;;  %1871 = vmatprep.mubr.msk.f32.mxu0 %vm2067_vm1, %v2066_v7 }
 0x160   :  { %1879 = vmatprep.subr.mxu0 %v2066_v7  ;;  %v901_v55 = vpop.permute.xlu1 %900 }
 0x161   :  { %v823_v52 = vpop.permute.xlu0 %822 }
 0x164   :  { %v899_v59 = vpop.permute.xlu1 %898 }
 0x165   :  { %v821_v58 = vpop.permute.xlu0 %820 }
 0x168   :  { %v1053_v61 = vpop.permute.xlu1 %1052 }
 0x169   :  { %v977_v60 = vpop.permute.xlu0 %976 }
 0x16c   :  { %v1211_v8 = vpop.permute.xlu1 %1210 }
 0x16d   :  { %v1133_v5 = vpop.permute.xlu0 %1132 }
 0x170   :  { %v1209_v14 = vpop.permute.xlu1 %1208 }
 0x171   :  { %v1131_v12 = vpop.permute.xlu0 %1130 }
 0x174   :  { %v1363_v19 = vpop.permute.xlu1 %1362 }
 0x175   :  { %v1287_v16 = vpop.permute.xlu0 %1286 }
 0x1b9   :  { %v283_v48 = vpop.f32.mrb[6].mxu1 }
 0x1ba   :  { %v1848_v49 = vpop.f32.mrb[7].mxu1 }
 0x1bd   :  { %v359_v50 = vpop.f32.mrb[8].mxu1 }
 0x1be   :  { %v1853_v51 = vpop.f32.mrb[9].mxu1 }
 0x22c   :  { %v437_v53 = vpop.f32.mrb[10].mxu1 }
 0x22d   :  { %v1858_v54 = vpop.f32.mrb[11].mxu1  ;;  %1867 = vmatmul.mubr.msk.f32.vlgmr.msra.gmra.mrb[12].mxu1 %vm523_vm2, %v437_v53  ;;  %v1488_v53 = vld [vmem:[%s2366_s2] sm:$0xff] }
 0x22e   :  { %1875 = vmatpush3.msra.mxu1 %v203_v41  ;;  %1876 = vmatprep.mubr.msk.f32.mxu1 %vm2067_vm1, %v2066_v7  ;;  %v1489_v54 = vld [vmem:[%s2366_s2 + $0x8] sm:$0xff] }
 0x22f   :  { %1884 = vmatprep.subr.mxu1 %v2066_v7 }
 0x230   :  { %v515_v56 = vpop.f32.mrb[0].mxu0 }
 0x231   :  { %v1863_v57 = vpop.f32.mrb[1].mxu0  ;;  %1872 = vmatmul.mubr.msk.f32.vlgmr.msra.gmra.mrb[2].mxu0 %vm523_vm2, %v515_v56  ;;  %1877 = vmatmul.mubr.msk.f32.vlgmr.msra.gmra.mrb[14].mxu1 %vm523_vm2, %v283_v48  ;;  %v1490_v56 = vld [vmem:[%s2366_s2 + $0x10] sm:$0xff] }
 0x232   :  { %1880 = vmatpush3.msra.mxu0 %v208_v39  ;;  %1881 = vmatprep.mubr.msk.f32.mxu0 %vm2067_vm1, %v2066_v7  ;;  %v1491_v57 = vld [vmem:[%s2366_s2 + $0x18] sm:$0xff]  ;;  %s2071_s2 = smov [#allocation2]  }
 0x233   :  { %1886 = vmatprep.mubr.msk.f32.mxu1 %vm2067_vm1, %v2066_v7  ;;  %1889 = vmatprep.subr.mxu0 %v2066_v7 }
 0x235   :  { %1885 = vmatpush3.xpose.msk.msra.mxu1 %vm52_vm0, %v823_v52  ;;  %1882 = vmatmul.mubr.msk.f32.vlgmr.msra.gmra.mrb[4].mxu0 %vm523_vm2, %v359_v50 }
 0x236   :  { %1894 = vmatprep.subr.mxu1 %v2066_v7  ;;  %1891 = vmatprep.mubr.msk.f32.mxu0 %vm2067_vm1, %v2066_v7 }
 0x238   :  { %1887 = vmatmul.mubr.msk.f32.vlgmr.msra.gmra.mrb[16].mxu1 %vm52_vm0, %v821_v58  ;;  %v1990_v58 = vpack.c.bf16 %v1491_v57, %v1490_v56 }
 0x239   :  { %1890 = vmatpush3.xpose.msk.msra.mxu0 %vm52_vm0, %v901_v55  ;;  %1895 = vmatpush3.msra.mxu1 %v977_v60  ;;  %v1986_v55 = vpack.c.bf16 %v1489_v54, %v1488_v53  ;;  %v1583_v60 = vld [vmem:[%s2367_s3 + $0x8] sm:$0xff] }
 0x23a   :  { %1899 = vmatprep.subr.mxu0 %v2066_v7  ;;  %1896 = vmatprep.mubr.msk.f32.mxu1 %vm2067_vm1, %v2066_v7 }
 0x23b   :  { %1904 = vmatprep.subr.mxu1 %v2066_v7 }
 0x23c   :  { %1892 = vmatmul.mubr.msk.f32.vlgmr.msra.gmra.mrb[6].mxu0 %vm52_vm0, %v899_v59  ;;  %v1582_v59 = vld [vmem:[%s2367_s3] sm:$0xff] }
 0x23d   :  { %1900 = vmatpush3.msra.mxu0 %v1053_v61  ;;  %1901 = vmatprep.mubr.msk.f32.mxu0 %vm2067_vm1, %v2066_v7  ;;  %v1584_v61 = vld [vmem:[%s2367_s3 + $0x10] sm:$0xff] }
 0x23e   :  { %1909 = vmatprep.subr.mxu0 %v2066_v7 }
 0x300   :  { %v593_v62 = vpop.f32.mrb[12].mxu1 }
 0x301   :  { %v1868_v63 = vpop.f32.mrb[13].mxu1 }
 0x302   :  { %v1585_v63 = vld [vmem:[%s2367_s3 + $0x18] sm:$0xff] }
 0x304   :  { %v670_v0 = vpop.f32.mrb[2].mxu0  ;;  %v743_v1 = vpop.f32.mrb[14].mxu1 }
 0x305   :  { %v744_v2 = vadd.f32 %v743_v1, %v593_v62  ;;  %v1873_v3 = vpop.f32.mrb[3].mxu0  ;;  %v1878_v4 = vpop.f32.mrb[15].mxu1  ;;  %v1994_v62 = vpack.c.bf16 %v1583_v60, %v1582_v59  ;;  %v1586_v1 = vld [vmem:[%s2367_s3 + $0x20] sm:$0xff] }
 0x306   :  { %v1588_v4 = vld [vmem:[%s2367_s3 + $0x30] sm:$0xff] }
 0x308   :  { %v816_v6 = vpop.f32.mrb[4].mxu0 }
 0x309   :  { %v817_v9 = vadd.f32 %v816_v6, %v670_v0  ;;  %v1883_v10 = vpop.f32.mrb[5].mxu0  ;;  %v1998_v0 = vpack.c.bf16 %v1585_v63, %v1584_v61  ;;  %v1770_v63 = vld [vmem:[%s2368_s4 + $0x5] ss:$0 sm:$0xff] }
 0x30b   :  { %v894_v11 = vpop.f32.mrb[16].mxu1 }
 0x30c   :  { %v1888_v13 = vpop.f32.mrb[17].mxu1  ;;  %1897 = vmatmul.mubr.msk.f32.vlgmr.msra.gmra.mrb[18].mxu1 %vm523_vm2, %v894_v11  ;;  %v1592_v11 = vld [vmem:[%s2367_s3 + $0x50] sm:$0xff] }
 0x30d   :  { %1905 = vmatpush3.xpose.msk.msra.mxu1 %vm52_vm0, %v1133_v5  ;;  %1906 = vmatprep.mubr.msk.f32.mxu1 %vm2067_vm1, %v2066_v7  ;;  %v1589_v5 = vld [vmem:[%s2367_s3 + $0x38] sm:$0xff] }
 0x30e   :  { %1914 = vmatprep.subr.mxu1 %v2066_v7  ;;  %v2006_v6 = vpack.c.bf16 %v1589_v5, %v1588_v4 }
 0x30f   :  { %v972_v15 = vpop.f32.mrb[6].mxu0 }
 0x310   :  { %v1893_v17 = vpop.f32.mrb[7].mxu0  ;;  %1902 = vmatmul.mubr.msk.f32.vlgmr.msra.gmra.mrb[8].mxu0 %vm523_vm2, %v972_v15  ;;  %1907 = vmatmul.mubr.msk.f32.vlgmr.msra.gmra.mrb[20].mxu1 %vm52_vm0, %v1131_v12  ;;  %v1593_v12 = vld [vmem:[%s2367_s3 + $0x58] sm:$0xff]  ;;  %v1595_v15 = vld [vmem:[%s2367_s3 + $0x68] sm:$0xff] }
 0x311   :  { %1910 = vmatpush3.xpose.msk.msra.mxu0 %vm52_vm0, %v1211_v8  ;;  %1915 = vmatpush3.msra.mxu1 %v1287_v16  ;;  %v1590_v8 = vld [vmem:[%s2367_s3 + $0x40] sm:$0xff]  ;;  %v2014_v13 = vpack.c.bf16 %v1593_v12, %v1592_v11 }
 0x312   :  { %1911 = vmatprep.mubr.msk.f32.mxu0 %vm2067_vm1, %v2066_v7  ;;  %1919 = vmatprep.subr.mxu0 %v2066_v7 }
 0x313   :  { %1916 = vmatprep.mubr.msk.f32.mxu1 %vm2067_vm1, %v2066_v7  ;;  %1987 = vmatprep.subr.bf16.mxu1 %v1986_v55 }
 0x314   :  { %1912 = vmatmul.mubr.msk.f32.vlgmr.msra.gmra.mrb[10].mxu0 %vm52_vm0, %v1209_v14  ;;  %v1594_v14 = vld [vmem:[%s2367_s3 + $0x60] sm:$0xff] }
 0x315   :  { %1920 = vmatpush3.msra.mxu0 %v1363_v19  ;;  %1921 = vmatprep.mubr.msk.f32.mxu0 %vm2067_vm1, %v2066_v7  ;;  %v2018_v16 = vpack.c.bf16 %v1595_v15, %v1594_v14 }
 0x316   :  { %1995 = vmatprep.subr.bf16.mxu0 %v1994_v62 }
 0x3df   :  { %v1048_v21 = vpop.f32.mrb[18].mxu1 }
 0x3e0   :  { %v1128_v22 = vadd.f32 %v1048_v21, %v744_v2  ;;  %v1898_v23 = vpop.f32.mrb[19].mxu1  ;;  %v1587_v2 = vld [vmem:[%s2367_s3 + $0x28] sm:$0xff] }
 0x3e1   :  { %v2002_v3 = vpack.c.bf16 %v1587_v2, %v1586_v1 }
 0x3e3   :  { %v1124_v24 = vpop.f32.mrb[8].mxu0  ;;  %v1204_v25 = vpop.f32.mrb[20].mxu1 }
 0x3e4   :  { %v1129_v26 = vadd.f32 %v1124_v24, %v817_v9  ;;  %v1903_v27 = vpop.f32.mrb[9].mxu0  ;;  %v1908_v28 = vpop.f32.mrb[21].mxu1  ;;  %1917 = vmatmul.mubr.msk.f32.vlgmr.msra.gmra.mrb[22].mxu1 %vm523_vm2, %v1204_v25  ;;  %v1591_v9 = vld [vmem:[%s2367_s3 + $0x48] sm:$0xff] }
 0x3e5   :  { %1989 = vmatpush3.bf16.msra.mxu1 %v1986_v55  ;;  %v2010_v10 = vpack.c.bf16 %v1591_v9, %v1590_v8 }
 0x3e6   :  { %1991 = vmatprep.subr.bf16.mxu1 %v1990_v58 }
 0x3e7   :  { %v1282_v29 = vpop.f32.mrb[10].mxu0 }
 0x3e8   :  { %v1913_v30 = vpop.f32.mrb[11].mxu0  ;;  %1922 = vmatmul.mubr.msk.f32.vlgmr.msra.gmra.mrb[12].mxu0 %vm523_vm2, %v1282_v29 }
 0x3e9   :  { %1993 = vmatpush3.bf16.msra.mxu1 %v1990_v58  ;;  %1997 = vmatpush3.bf16.msra.mxu0 %v1994_v62 }
 0x3ea   :  { %1999 = vmatprep.subr.bf16.mxu0 %v1998_v0 }
 0x3ed   :  { %2001 = vmatpush3.bf16.msra.mxu0 %v1998_v0 }
 0x3ee   :  { %2003 = vmatprep.subr.bf16.mxu0 %v2002_v3 }
 0x3f1   :  { %2005 = vmatpush3.bf16.msra.mxu0 %v2002_v3 }
 0x3f2   :  { %2007 = vmatprep.subr.bf16.mxu0 %v2006_v6 }
 0x3f5   :  { %2009 = vmatpush3.bf16.msra.mxu0 %v2006_v6 }
 0x3f6   :  { %2011 = vmatprep.subr.bf16.mxu0 %v2010_v10 }
 0x3f9   :  { %2013 = vmatpush3.bf16.msra.mxu0 %v2010_v10 }
 0x3fa   :  { %2015 = vmatprep.subr.bf16.mxu0 %v2014_v13 }
 0x3fd   :  { %2017 = vmatpush3.bf16.msra.mxu0 %v2014_v13 }
 0x3fe   :  { %2019 = vmatprep.subr.bf16.mxu0 %v2018_v16 }
 0x401   :  { %2021 = vmatpush3.bf16.msra.mxu0 %v2018_v16 }
 0x4b7   :  { %v1358_v31 = vpop.f32.mrb[22].mxu1 }
 0x4b8   :  { %v1438_v7 = vadd.f32 %v1358_v31, %v1128_v22  ;;  %v1918_v33 = vpop.f32.mrb[23].mxu1 }
 0x4ba   :  { %v1447_v34 = vadd.f32 %v1766_v32, %v1438_v7 }
 0x4bb   :  { %v1434_v35 = vpop.f32.mrb[12].mxu0 }
 0x4bc   :  { %v1439_v36 = vadd.f32 %v1434_v35, %v1129_v26  ;;  %v1923_v37 = vpop.f32.mrb[13].mxu0  ;;  %v1449_v38 = vadd.f32 %v1447_v34, %v2145_v18  ;;  %v1596_v34 = vld [vmem:[%s2367_s3 + $0x70] sm:$0xff]  ;;  %v1597_v35 = vld [vmem:[%s2367_s3 + $0x78] sm:$0xff] }
 0x4bd   :  { %v1767_v37 = vld [vmem:[%s2368_s4 + $0x3] ss:$0 sm:$0xff]  ;;  %s1727_s4 = sshll.u32 %s2071_s2, 4  ;;  %s1728_s4 = int_to_ptr.vmem [resolvable:$true] %s1727_s4 }
 0x4be   :  { %v1448_v39 = vadd.f32 %v1766_v32, %v1439_v36  ;;  %v1451_v40 = vsel %vm52_vm0, %v1449_v38, 0.0  ;;  %v2022_v36 = vpack.c.bf16 %v1597_v35, %v1596_v34  ;;  %p2047_p1 = scmp.lt.s32.totalorder %s1728_s4, %s1728_s4 }
 0x4bf   :  { %1452 = vadd.xlane.f32.xlu0 %v1451_v40 }
 0x4c0   :  { %v1450_v41 = vadd.f32 %v1448_v39, %v2153_v20  ;;  %2023 = vmatprep.subr.bf16.mxu0 %v2022_v36 }
 0x4c1   :  { %2025 = vmatpush3.bf16.msra.mxu0 %v2022_v36 }
 0x4c2   :  { %v1454_v42 = vsel %vm52_vm0, %v1450_v41, 0.0 }
 0x4c3   :  { %1455 = vadd.xlane.f32.xlu1 %v1454_v42 }
 0x4d4   :  { %1478 = vrot.lane.b32.xlu1 %v1766_v32, %s2068_s21 }
 0x4d8   :  { %1598 = vrot.lane.b32.xlu1 %v1766_v32, %s2070_s23 }
 0x54c   :  { %v1453_v43 = vpop.xlane.xlu0 %1452 }
 0x54d   :  { %v1458_v44 = vmul.f32 0.03125, %v1453_v43 }
 0x54f   :  { %v2262_v45 = vsub.f32 %v1449_v38, %v1458_v44 }
 0x550   :  { %v1456_v46 = vpop.xlane.xlu1 %1455 }
 0x551   :  { %v1459_v47 = vmul.f32 0.03125, %v1456_v46  ;;  %v1462_v48 = vmul.f32 %v2262_v45, %v2262_v45 }
 0x553   :  { %v2266_v49 = vsub.f32 %v1450_v41, %v1459_v47  ;;  %v1464_v50 = vsel %vm52_vm0, %v1462_v48, 0.0 }
 0x554   :  { %1465 = vadd.xlane.f32.xlu0 %v1464_v50  ;;  %v1479_v26 = vpop.permute.xlu1 %1478 }
 0x555   :  { %v1463_v51 = vmul.f32 %v2266_v49, %v2266_v49 }
 0x557   :  { %v1467_v52 = vsel %vm52_vm0, %v1463_v51, 0.0 }
 0x558   :  { %1468 = vadd.xlane.f32.xlu0 %v1467_v52  ;;  %v1599_v44 = vpop.permute.xlu1 %1598 }
 0x56e   :  { %1483 = vrot.lane.b32.xlu0 %v1766_v32, %s2069_s22 }
 0x5e1   :  { %v1466_v17 = vpop.xlane.xlu0 %1465 }
 0x5e2   :  { %v1470_v19 = vmul.f32 0.03125, %v1466_v17 }
 0x5e4   :  { %v1472_v21 = vadd.f32 1e-05, %v1470_v19 }
 0x5e5   :  { %v1469_v22 = vpop.xlane.xlu0 %1468 }
 0x5e6   :  { %2034 = vrsqrt.f32 %v1472_v21  ;;  %v1471_v23 = vmul.f32 0.03125, %v1469_v22 }
 0x5e8   :  { %v1473_v24 = vadd.f32 1e-05, %v1471_v23 }
 0x5e9   :  { %v1484_v28 = vpop.permute.xlu0 %1483 }
 0x5ea   :  { %2036 = vrsqrt.f32 %v1473_v24 }
 0x5f0   :  { %v2035_v25 = vpop.eup %2034 }
 0x5f1   :  { %v1476_v27 = vmul.f32 %v2035_v25, %v2262_v45 }
 0x5f3   :  { %v1481_v29 = vmul.f32 %v1479_v26, %v1476_v27 }
 0x5f4   :  { %v2037_v30 = vpop.eup %2036 }
 0x5f5   :  { %v1477_v31 = vmul.f32 %v2037_v30, %v2266_v49  ;;  %v1486_v32 = vadd.f32 %v1484_v28, %v1481_v29 }
 0x5f7   :  { %v1482_v7 = vmul.f32 %v1479_v26, %v1477_v31  ;;  %1932 = vmatprep.mubr.msk.f32.mxu1 %vm52_vm0, %v1486_v32 }
 0x5f9   :  { %v1487_v33 = vadd.f32 %v1484_v28, %v1482_v7 }
 0x5fb   :  { %1933 = vmatmul.mubr.msk.f32.vlgmr.msra.gmra.mrb[24].mxu1 %vm52_vm0, %v1487_v33 }
 0x6ce   :  { %v1934_v38 = vpop.f32.mrb[24].mxu1 }
 0x6cf   :  { %v1577_v39 = vadd.f32 %v1934_v38, %v1767_v37  ;;  %v1571_v40 = vpop.f32.mrb[25].mxu1 }
 0x6d0   :  { %v1572_v41 = vadd.f32 %v1767_v37, %v1571_v40 }
 0x6d1   :  { %v1581_v43 = vmax.f32 %v1577_v39, 0.0 }
 0x6d2   :  { %v1580_v42 = vmax.f32 %v1572_v41, 0.0 }
 0x6d4   :  { %1967 = vmatprep.mubr.f32.mxu0 %v1580_v42 }
 0x6d5   :  { %1968 = vmatmul.mubr.f32.vlgmr.msra.gmra.mrb[14].mxu0 %v1581_v43 }
 0x7a8   :  { %v1969_v45 = vpop.f32.mrb[14].mxu0 }
 0x7a9   :  { %v1673_v46 = vadd.f32 %v1969_v45, %v1599_v44  ;;  %v1667_v47 = vpop.f32.mrb[15].mxu0 }
 0x7aa   :  { %v1668_v48 = vadd.f32 %v1667_v47, %v1599_v44 }
 0x7ab   :  { %v1677_v49 = vadd.f32 %v1673_v46, %v1487_v33 }
 0x7ac   :  { %v1676_v50 = vadd.f32 %v1668_v48, %v1486_v32 }
 0x7ad   :  { %v1682_v51 = vsel %vm52_vm0, %v1677_v49, 0.0 }
 0x7ae   :  { %1683 = vadd.xlane.f32.xlu0 %v1682_v51  ;;  %v1679_v52 = vsel %vm52_vm0, %v1676_v50, 0.0 }
 0x7af   :  { %1680 = vadd.xlane.f32.xlu1 %v1679_v52 }
 0x83b   :  { %v1684_v53 = vpop.xlane.xlu0 %1683 }
 0x83c   :  { %v1686_v54 = vmul.f32 0.03125, %v1684_v53  ;;  %v1681_v55 = vpop.xlane.xlu1 %1680 }
 0x83d   :  { %v1685_v56 = vmul.f32 0.03125, %v1681_v55 }
 0x83e   :  { %v1688_v57 = vsub.f32 %v1677_v49, %v1686_v54 }
 0x83f   :  { %v1687_v58 = vsub.f32 %v1676_v50, %v1685_v56 }
 0x840   :  { %v1690_v59 = vmul.f32 %v1688_v57, %v1688_v57 }
 0x841   :  { %v1689_v60 = vmul.f32 %v1687_v58, %v1687_v58 }
 0x842   :  { %v1694_v61 = vsel %vm52_vm0, %v1690_v59, 0.0 }
 0x843   :  { %1695 = vadd.xlane.f32.xlu1 %v1694_v61  ;;  %v1691_v62 = vsel %vm52_vm0, %v1689_v60, 0.0 }
 0x844   :  { %1692 = vadd.xlane.f32.xlu0 %v1691_v62 }
 0x85a   :  { %1713 = vrot.lane.b32.xlu0 %v1770_v63, %s2068_s21  ;;  %s2042_s21 = scalar_lea.vmem %s1728_s4, 256 }
 0x85b   :  { %p2043_p0 = scmp.ne.s32.totalorder %s1728_s4, %s2042_s21  ;;  %p2048_p2 = scmp.lt.s32.totalorder %s2042_s21, %s2042_s21 }
 0x85d   :  { %p2049_p3 = por %p2048_p2, %p2047_p1 }
 0x85f   :  { %p2050_p4 = pnand %p2049_p3, %p2043_p0 }
 0x8d0   :  { %v1696_v0 = vpop.xlane.xlu1 %1695 }
 0x8d1   :  { %v1698_v1 = vmul.f32 0.03125, %v1696_v0  ;;  %v1693_v2 = vpop.xlane.xlu0 %1692 }
 0x8d2   :  { %v1697_v3 = vmul.f32 0.03125, %v1693_v2 }
 0x8d3   :  { %v1700_v4 = vadd.f32 1e-05, %v1698_v1 }
 0x8d4   :  { %v1699_v5 = vadd.f32 1e-05, %v1697_v3 }
 0x8d5   :  { %2038 = vrsqrt.f32 %v1700_v4  ;;  %v1714_v11 = vpop.permute.xlu0 %1713 }
 0x8d6   :  { %2040 = vrsqrt.f32 %v1699_v5 }
 0x8df   :  { %v2039_v6 = vpop.eup %2038 }
 0x8e0   :  { %v2041_v8 = vpop.eup %2040  ;;  %v1704_v9 = vmul.f32 %v2039_v6, %v1688_v57 }
 0x8e1   :  { %v1703_v10 = vmul.f32 %v2041_v8, %v1687_v58 }
 0x8e2   :  { %v1712_v12 = vmul.f32 %v1770_v63, %v1704_v9 }
 0x8e3   :  { %v1711_v13 = vmul.f32 %v1770_v63, %v1703_v10 }
 0x8e4   :  { %v1717_v14 = vadd.f32 %v1714_v11, %v1712_v12 }
 0x8e5   :  { %v1716_v15 = vadd.f32 %v1714_v11, %v1711_v13 }
 0x8e6   :  { %v1719_v16 = vadd.f32 %v1717_v14, %v2153_v20 }
 0x8e7   :  { %v1718_v17 = vadd.f32 %v1716_v15, %v2145_v18 }
 0x8e8   :  { %1721 = vst.msk [vmem:[#allocation2 + $0x8] sm:$0xff] %vm52_vm0, %v1719_v16 }
 0x8e9   :  { %1720 = vst.msk [vmem:[#allocation2] sm:$0xff] %vm52_vm0, %v1718_v17 }
 0x8ea   :  { %2053 = shalt.err (!%p2050_p4)
}
 0x8eb   :  { %s2054_s19 = scalar_lea.hbm %s2369_s5, 256 }
 0x8ec   :  { %p2055_p5 = scmp.ne.s32.totalorder %s2369_s5, %s2054_s19  ;;  %p2058_p6 = scmp.lt.u32.totalorder %s2054_s19, %s2369_s5 }
 0x8ee   :  { %p2060_p7 = pnand %p2058_p6, %p2055_p5 }
 0x8f0   :  { %2063 = shalt.err (!%p2060_p7)
}
 0x8f1   :  { %s2072_s23 = smov 128   ;;  %s2073_s24 = smov 8  }
 0x8f2   :  { %1733 = dma.vmem_to_hbm [thread:$0]  %s1728_s4, 256, %s2369_s5, [#allocation3], %s2072_s23, %s2072_s23, %s2073_s24  }
 0x8f3   :  { %2064 = dma.done.wait [#allocation3], 256  }
 0x8f4   :  { %2065 = vsyncadd [#allocation3], 4294967040 }
 0x8f5   :  { %1737 = vsyncpa [#allocation3], 1 }

</bundles_post_ra>
